<compile_context>
chip_gen: v5e
topology: v5e:2x2
jax: 0.10.0
libtpu: 0.0.40
codegen_flags: <defaults>
</compile_context>

<pallas_src>
import jax
import jax.numpy as jnp
from jax.experimental import pallas as pl
from jax.experimental.pallas import tpu as pltpu


def _round_up(x, m):
    return (x + m - 1) // m * m


def _cdiv(a, b):
    return -(-a // b)


def _unembed_kernel(x_ref, o_ref):
    # x_ref: (t_hw, t_c) token tile for one batch element; o_ref: (t_c, t_hw).
    # The only work is the XLU transpose; the kernel is HBM-bandwidth bound.
    o_ref[...] = x_ref[...].T


def _pick_c_tile(C):
    """Tile the channel axis only when it is large; prefer 256 for grid parallelism."""
    if C >= 256:
        for t in (256, 384, 512, 128):
            if C % t == 0:
                return t
    return C  # full-array-dim block -> exempt from the 128-lane rule


def _vmem_cap_bytes():
    """Generation-aware VMEM cap: ~75% of physical, 48 MiB fallback (safe even on v7x)."""
    try:
        info = pltpu.get_tpu_info()
        cap = getattr(info, "vmem_capacity_bytes", None)
        if cap:
            return int(0.75 * cap)
    except Exception:
        pass
    return 48 * 1024 * 1024


def _pick_hw_tile(HW, t_c, itemsize, byte_target=3 * 1024 * 1024):
    """Largest balanced 128-multiple token tile whose padded in+out footprint ~ byte_target."""
    in_row = _round_up(t_c, 128) * itemsize   # input tile row (lane-padded C)
    out_row = _round_up(t_c, 8) * itemsize    # output tile column (sublane-padded C)
    per_granule = 128 * (in_row + out_row)    # bytes of real data per 128-token granule
    budget_granules = max(1, byte_target // per_granule)
    total_granules = _round_up(HW, 128) // 128
    n_tiles = _cdiv(total_granules, budget_granules)
    return _cdiv(total_granules, n_tiles) * 128  # balanced -> minimal end-of-axis padding


def patch_unembed(x, x_size, embed_dim):
    """x: (B, HW, C) -> (B, embed_dim, H, W), matching PatchUnEmbed.forward."""
    B, HW, C = x.shape
    H, W = x_size
    assert C == embed_dim, "channel dim must equal embed_dim"
    assert HW == H * W, "token count must equal H*W"

    itemsize = jnp.dtype(x.dtype).itemsize
    t_c = _pick_c_tile(C)
    t_hw = _pick_hw_tile(HW, t_c, itemsize)

    # Pad tokens so the grid divides exactly: all stores stay unmasked & lane-dense,
    # and no single block can ever exceed VMEM regardless of HW.
    HW_pad = _round_up(HW, t_hw)
    x_padded = x if HW_pad == HW else jnp.pad(x, ((0, 0), (0, HW_pad - HW), (0, 0)))
    n_hw = HW_pad // t_hw
    n_c = C // t_c

    # Real per-step VMEM footprint with lane/sublane padding, double buffered in+out.
    in_tile_bytes = t_hw * _round_up(t_c, 128) * itemsize
    out_tile_bytes = _round_up(t_c, 8) * t_hw * itemsize
    vmem_need = 2 * (in_tile_bytes + out_tile_bytes)
    vmem_limit = int(min(max(2 * vmem_need, 16 * 1024 * 1024), _vmem_cap_bytes()))

    cost = pl.CostEstimate(
        flops=0,
        transcendentals=0,
        bytes_accessed=2 * B * HW_pad * C * itemsize,
    )

    out_chw = pl.pallas_call(
        _unembed_kernel,
        out_shape=jax.ShapeDtypeStruct((B, C, HW_pad), x.dtype),
        grid_spec=pltpu.PrefetchScalarGridSpec(
            num_scalar_prefetch=0,
            grid=(B, n_c, n_hw),
            in_specs=[
                # (t_hw, t_c): sublane dim is a multiple of 128; lane dim is either a
                # multiple of 128 (tiled C) or the full array dim (small C) -> legal.
                pl.BlockSpec((pl.Squeezed(), t_hw, t_c),
                             lambda b, c, t: (b, t, c)),
            ],
            # (t_c, t_hw): lane dim t_hw is a large multiple of 128 -> unmasked vst.
            out_specs=pl.BlockSpec((pl.Squeezed(), t_c, t_hw),
                                   lambda b, c, t: (b, c, t)),
        ),
        compiler_params=pltpu.CompilerParams(
            dimension_semantics=("parallel", "parallel", "parallel"),
            vmem_limit_bytes=vmem_limit,
        ),
        cost_estimate=cost,
    )(x_padded)

    if HW_pad != HW:
        out_chw = out_chw[:, :, :HW]
    # Free reshape of the lane-contiguous HW axis into (H, W) -> NCHW.
    return out_chw.reshape(B, embed_dim, H, W)


def _reference(x, x_size, embed_dim):
    B, HW, C = x.shape
    H, W = x_size
    return jnp.transpose(x, (0, 2, 1)).reshape(B, embed_dim, H, W)


if __name__ == "__main__":
    key = jax.random.PRNGKey(0)
    k1, k2, k3 = jax.random.split(key, 3)

    # Case 1: module-scale tiny shape (B=2, H=W=8, embed_dim=32). HW=64 is not a
    # multiple of 128 -> exercises the wrapper padding + slice path.
    B, H, W, C = 2, 8, 8, 32
    x_small = jax.random.normal(k1, (B, H * W, C), dtype=jnp.float32)
    out_small = jax.block_until_ready(patch_unembed(x_small, (H, W), C))
    ref_small = _reference(x_small, (H, W), C)
    assert out_small.shape == (B, C, H, W)
    assert out_small.dtype == x_small.dtype
    assert jnp.allclose(out_small, ref_small)

    # Case 2: H=W=64 -> HW=4096; a single lane-dense token tile per batch element.
    B, H, W, C = 2, 64, 64, 32
    x_med = jax.random.normal(k2, (B, H * W, C), dtype=jnp.float32)
    out_med = jax.block_until_ready(patch_unembed(x_med, (H, W), C))
    assert out_med.shape == (B, C, H, W)
    assert jnp.allclose(out_med, _reference(x_med, (H, W), C))

    # Case 3: C=512 -> channel-tiled path (t_c=256, 2 C-tiles) plus a multi-tile,
    # padded HW axis (HW=1600 -> 2 token tiles).
    B, H, W, C = 1, 40, 40, 512
    x_big = jax.random.normal(k3, (B, H * W, C), dtype=jnp.float32)
    out_big = jax.block_until_ready(patch_unembed(x_big, (H, W), C))
    assert out_big.shape == (B, C, H, W)
    assert jnp.allclose(out_big, _reference(x_big, (H, W), C))

    print("KERNEL_OK")
</pallas_src>

<mosaic_0001>
module attributes {stable_mosaic.version = 11 : i64} {
  func.func @_unembed_kernel(%arg0: i32, %arg1: i32, %arg2: i32, %arg3: memref<1x128x32xf32, #tpu.memory_space<vmem>>, %arg4: memref<1x32x128xf32, #tpu.memory_space<vmem>>) attributes {dimension_semantics = [#tpu.dimension_semantics<parallel>, #tpu.dimension_semantics<parallel>, #tpu.dimension_semantics<parallel>], iteration_bounds = array<i64: 2, 1, 1>, scalar_prefetch = 0 : i64, scratch_operands = 0 : i64, tpu.core_type = #tpu.core_type<tc>, window_params = [{transform_indices = @transform_0, window_bounds = array<i64: 1, 128, 32>}, {transform_indices = @transform_1, window_bounds = array<i64: 1, 32, 128>}]} {
    %c0 = arith.constant 0 : index
    %c0_0 = arith.constant 0 : index
    %c0_1 = arith.constant 0 : index
    %0 = vector.load %arg3[%c0, %c0_0, %c0_1] : memref<1x128x32xf32, #tpu.memory_space<vmem>>, vector<1x128x32xf32>
    %1 = vector.shape_cast %0 : vector<1x128x32xf32> to vector<128x32xf32>
    %2 = tpu.transpose %1, [1, 0] : vector<128x32xf32> -> vector<32x128xf32>
    %c0_2 = arith.constant 0 : index
    %c0_3 = arith.constant 0 : index
    %c0_4 = arith.constant 0 : index
    %3 = vector.load %arg4[%c0_2, %c0_3, %c0_4] : memref<1x32x128xf32, #tpu.memory_space<vmem>>, vector<1x32x128xf32>
    %4 = vector.shape_cast %3 : vector<1x32x128xf32> to vector<32x128xf32>
    %5 = vector.shape_cast %2 : vector<32x128xf32> to vector<1x32x128xf32>
    tpu.vector_store %arg4[%c0_2, %c0_3, %c0_4], %5 {strides = array<i32>} : memref<1x32x128xf32, #tpu.memory_space<vmem>>, vector<1x32x128xf32>,
    return
  }
  func.func @transform_0(%arg0: i32, %arg1: i32, %arg2: i32) -> (i32, i32, i32) {
    %c0_i32 = arith.constant 0 : i32
    return %arg0, %arg2, %arg1 : i32, i32, i32
  }
  func.func @transform_1(%arg0: i32, %arg1: i32, %arg2: i32) -> (i32, i32, i32) {
    %c0_i32 = arith.constant 0 : i32
    return %arg0, %arg1, %arg2 : i32, i32, i32
  }
}

</mosaic_0001>

<bundles_post_ra>
// kernel: tpu_custom_call.1
= control target key start
LH: loop header
LB: loop body
LE: loop exit
PB: predicated region body
PF: predicated region fallthrough
CT: control target
= control target key end

     0   :  { %6 = vsyncpa [#allocation3], 0  ;;  %s602_s0 = inlined_call_operand.vmem [shape: f32[2,128,32], index: 0, kind: input, shape index: {}]   ;;  %s603_s1 = inlined_call_operand.hbm [shape: f32[2,32,128], index: 1, kind: output, shape index: {}]  }
   0x1   :  { %8 = vsyncpa [#allocation3 + $0x1], 0  ;;  %s487_s6 = smov 0   ;;  %s489_s7 = smov 0  }
   0x2   :  { %s491_s8 = smov 0   ;;  %s493_s9 = smov 0  }
   0x3   :  { %s495_s10 = smov 0   ;;  %s497_s11 = smov 0  }
   0x4 LB: > { %s323_s12 = sadd.s32 4294967295, %s473_s11   ;;  %s324_s13 = sadd.s32 4294967294, %s473_s11   ;;  %s473_s11 = sphi %s497_s11, %s14_s11   ;;  %s469_s10 = sphi %s495_s10, %s610_s10   ;;  %s465_s9 = sphi %s493_s9, %s609_s9   ;;  %s461_s8 = sphi %s491_s8, %s608_s8   ;;  %s457_s7 = sphi %s489_s7, %s607_s7   ;;  %s453_s6 = sphi %s487_s6, %s606_s6  }
   0x5   : > { %s33_s14 = sadd.s32 1, %s469_s10  ;;  %s74_s15 = sadd.s32 1, %s461_s8 }
   0x6   : > { %p35_p0 = scmp.ge.s32.totalorder %s33_s14, 2  ;;  %p84_p1 = scmp.ne.s32.totalorder %s461_s8, %s457_s7 }
   0x7   : > { %p85_p2 = scmp.eq.s32.totalorder %s323_s12, 1  ;;  %p90_p3 = scmp.ne.s32.totalorder %s457_s7, %s453_s6 }
   0x8   : > { %s612_s14 = smov (%p35_p0, %s33_s14), 0  ;;  %p91_p5 = scmp.eq.s32.totalorder %s324_s13, 1 }
   0x9   : > { %p527_p4 = por %p85_p2, %p84_p1  ;;  %s67_s17 = ssub.s32 %s469_s10, %s612_s14 }
   0xa   : > { %p327_p6 = scmp.ge.s32.totalorder %s473_s11, 1  ;;  %p72_p7 = scmp.eq.s32.totalorder %s67_s17, 0 }
   0xb   : > { %p534_p8 = por %p91_p5, %p90_p3  ;;  %p125_p9 = scmp.lt.s32.totalorder %s473_s11, 3 }
   0xc   : > { %s540_s19 = scalar_select %p72_p7, %s461_s8, %s74_s15  }
   0xd   : > { %p126_p10 = pnand %p327_p6, %p125_p9 }
   0xe   : > { %p153_p11 = scmp.lt.s32.totalorder (!%p126_p10), %s465_s9, 1  ;;  %s149_s25 = sand.u32 (!%p126_p10), 1, %s457_s7  }
   0xf   : > { %129 = sbr.rel (%p126_p10) target bundleno = 218 (0xda), region = 24  ;;  %s328_s26 = sshll.u32 (!%p126_p10), %s149_s25, 5 }
  0x10   : > { %s151_s27 = scalar_lea.vmem (!%p126_p10), [#allocation2], %s328_s26  ;;  %s337_s28 = sshll.u32 (!%p126_p10), %s465_s9, 5 }
  0x11   : > { %s233_s2 = scalar_lea.hbm (!%p126_p10), %s603_s1, %s337_s28  ;;  %s234_s3 = sshll.u32 (!%p126_p10), %s151_s27, 4  ;;  %s235_s3 = int_to_ptr.vmem [resolvable:$true] %s234_s3 }
  0x12   : > { %s236_s4 = sshll.u32 (!%p126_p10), %s233_s2, 4  ;;  %s219_s5 = scalar_lea.sflag (!%p126_p10), [#allocation3], %s149_s25  ;;  %s237_s4 = int_to_ptr.hbm [resolvable:$true] %s236_s4 }
  0x13   : > { %s409_s12 = sshra.s32 (!%p126_p10), %s237_s4, 4  ;;  %s415_s17 = scalar_lea.hbm (!%p126_p10), %s603_s1, 64  ;;  %s410_s12 = int_to_ptr.hbm [resolvable:$true] %s409_s12 }
  0x14   : > { %s154_s20 = scalar_select %p153_p11, %s465_s9, 1 }
  0x15   : > { %s411_s13 = scalar_lea.hbm %s410_s12, 32  ;;  %p416_p1 = scmp.lt.s32.totalorder %s410_s12, %s603_s1 }
  0x16   : > { %s336_s21 = sshll.u32 %s154_s20, 7  ;;  %p412_p12 = scmp.ne.s32.totalorder %s410_s12, %s411_s13 }
  0x17   : > { %s547_s24 = scalar_lea.vmem %s602_s0, %s336_s21  ;;  %p417_p2 = scmp.lt.s32.totalorder %s415_s17, %s411_s13 }
  0x18   : > { %v166_v0 = vld [vmem:[%s547_s24] sm:$0xff]  ;;  %v167_v1 = vld [vmem:[%s547_s24 + $0x8] sm:$0xff]  ;;  %v168_v2 = vld [vmem:[%s547_s24 + $0x10] sm:$0xff]  ;;  %p413_p13 = pnand %p412_p12, %p527_p4 }
  0x19   : > { %182 = vxpose.xlu0.b32.start [1/16] (narrow) %v166_v0, 32  ;;  %v169_v3 = vld [vmem:[%s547_s24 + $0x18] sm:$0xff]  ;;  %v170_v4 = vld [vmem:[%s547_s24 + $0x20] sm:$0xff]  ;;  %v171_v5 = vld [vmem:[%s547_s24 + $0x28] sm:$0xff]  ;;  %p418_p3 = por %p417_p2, %p416_p1 }
  0x1a   : > { %v172_v6 = vld [vmem:[%s547_s24 + $0x30] sm:$0xff]  ;;  %v173_v7 = vld [vmem:[%s547_s24 + $0x38] sm:$0xff]  ;;  %v174_v8 = vld [vmem:[%s547_s24 + $0x40] sm:$0xff]  ;;  %p414_p0 = pneg %p413_p13 }
  0x1b   : > { %v175_v9 = vld [vmem:[%s547_s24 + $0x48] sm:$0xff]  ;;  %v176_v10 = vld [vmem:[%s547_s24 + $0x50] sm:$0xff]  ;;  %v177_v11 = vld [vmem:[%s547_s24 + $0x58] sm:$0xff] }
  0x1c   : > { %v178_v12 = vld [vmem:[%s547_s24 + $0x60] sm:$0xff]  ;;  %v179_v13 = vld [vmem:[%s547_s24 + $0x68] sm:$0xff]  ;;  %v180_v14 = vld [vmem:[%s547_s24 + $0x70] sm:$0xff]  ;;  %p419_p5 = pnand %p418_p3, %p414_p0 }
  0x1d   : > { %v181_v15 = vld [vmem:[%s547_s24 + $0x78] sm:$0xff] }
  0x21   : > { %183 = vxpose.xlu0.b32.cont [2/16] (narrow) %v167_v1, 32 }
  0x29   : > { %184 = vxpose.xlu0.b32.cont [3/16] (narrow) %v168_v2, 32 }
  0x31   : > { %185 = vxpose.xlu0.b32.cont [4/16] (narrow) %v169_v3, 32 }
  0x39   : > { %186 = vxpose.xlu0.b32.cont [5/16] (narrow) %v170_v4, 32 }
  0x41   : > { %187 = vxpose.xlu0.b32.cont [6/16] (narrow) %v171_v5, 32 }
  0x49   : > { %188 = vxpose.xlu0.b32.cont [7/16] (narrow) %v172_v6, 32 }
  0x51   : > { %189 = vxpose.xlu0.b32.cont [8/16] (narrow) %v173_v7, 32 }
  0x59   : > { %190 = vxpose.xlu0.b32.cont [9/16] (narrow) %v174_v8, 32 }
  0x61   : > { %191 = vxpose.xlu0.b32.cont [10/16] (narrow) %v175_v9, 32 }
  0x69   : > { %192 = vxpose.xlu0.b32.cont [11/16] (narrow) %v176_v10, 32 }
  0x71   : > { %193 = vxpose.xlu0.b32.cont [12/16] (narrow) %v177_v11, 32 }
  0x79   : > { %194 = vxpose.xlu0.b32.cont [13/16] (narrow) %v178_v12, 32 }
  0x81   : > { %195 = vxpose.xlu0.b32.cont [14/16] (narrow) %v179_v13, 32 }
  0x89   : > { %196 = vxpose.xlu0.b32.cont [15/16] (narrow) %v180_v14, 32 }
  0x91   : > { %197 = vxpose.xlu0.b32.end [16/16] (narrow) %v181_v15, 32 }
  0xbd   : > { %v198_v16 = vpop.trf.xlu0 }
  0xbe   : > { %214 = vst [vmem:[%s151_s27] sm:$0xff] %v198_v16 }
  0xc5   : > { %v199_v17 = vpop.trf.xlu0 }
  0xc6   : > { %215 = vst [vmem:[%s151_s27 + $0x8] sm:$0xff] %v199_v17 }
  0xcd   : > { %v200_v18 = vpop.trf.xlu0 }
  0xce   : > { %216 = vst [vmem:[%s151_s27 + $0x10] sm:$0xff] %v200_v18 }
  0xd5   : > { %v201_v19 = vpop.trf.xlu0 }
  0xd6   : > { %217 = vst [vmem:[%s151_s27 + $0x18] sm:$0xff] %v201_v19 }
  0xd7   : > { %422 = shalt.err (!%p419_p5)
}
  0xd8   : > { %s475_s22 = smov 128   ;;  %s476_s23 = smov 8  }
  0xd9   : > { %338 = dma.vmem_to_hbm [thread:$0]  (%p527_p4), %s235_s3, 512, %s237_s4, %s219_s5, %s475_s22, %s475_s22, %s476_s23  }
  0xda PF: > { %p344_p6 = scmp.ge.s32.totalorder %s473_s11, 2  ;;  %s251_s24 = sand.u32 1, %s453_s6  }
  0xdb   : > { %s252_s25 = scalar_lea.sflag [#allocation3], %s251_s24 }
  0xdc   : > { %p341_p7 = pnand %p344_p6, %p534_p8 }
  0xde   : > { %p342_p9 = pneg %p341_p7 }
  0xe0   : > { %448 = dma.done.wait (%p342_p9), %s252_s25, 512  }
  0xe1   : > { %450 = vsyncadd (%p342_p9), %s252_s25, 4294966784  ;;  %s14_s11 = sadd.s32 1, %s473_s11   ;;  %s606_s6 = smov %s457_s7 }
  0xe2   : > { %p11_p10 = scmp.ge.s32.totalorder %s14_s11, 4   ;;  %s607_s7 = smov %s461_s8 }
  0xe3   : > { %s608_s8 = smov %s540_s19  ;;  %s609_s9 = smov %s469_s10 }
  0xe4   : > { %s610_s10 = smov %s612_s14  ;;  %13 = sbr.rel (!%p11_p10) target bundleno = 4 (0x4), region = 59 }
  0xe9   :  { %258 = vsyncpa [#allocation3], 1 }
  0xea   :  { %260 = vsyncpa [#allocation3 + $0x1], 1 }

</bundles_post_ra>
